<compile_context>
chip_gen: v7x
topology: tpu7x:2x2x1
jax: 0.10.0
libtpu: 0.0.40
codegen_flags: <defaults>
</compile_context>

<pallas_src>
import jax
import jax.numpy as jnp
from jax.experimental import pallas as pl
from jax.experimental.pallas import tpu as pltpu


def actor_kernel(x_ref, w1_ref, b1_ref, w2_ref, b2_ref, o_ref):
    # layer1: x @ W1 (MXU, f32 accumulate) + b1 (f32, VPU), ReLU
    h = jnp.dot(x_ref[...], w1_ref[...], preferred_element_type=jnp.float32)
    h = jnp.maximum(h + b1_ref[...], 0.0)            # b1 is (1, H_pad) -> broadcasts over rows
    # layer2: h @ W2 + b2 ; cast h to the weight dtype so bf16 weights hit the bf16 MXU path
    o = jnp.dot(h.astype(w2_ref.dtype), w2_ref[...], preferred_element_type=jnp.float32)
    o_ref[...] = (o + b2_ref[...]).astype(o_ref.dtype)


def _round_up(n, m):
    return ((n + m - 1) // m) * m


def prepare_actor_params(w1, b1, w2, b2, *, compute_dtype=jnp.float32):
    """One-time parameter prep (hoisted out of the forward path).

    w1: (in_dim, hidden), b1: (hidden,) or (1, hidden)
    w2: (hidden, out_dim), b2: (out_dim,) or (1, out_dim)

    Hidden dim is zero-padded to 128 lanes; padded channels are exact no-ops
    (relu(0 + 0) = 0 and the corresponding W2 rows are zero). out_dim stays unpadded.
    """
    in_dim, hidden = w1.shape
    out_dim = w2.shape[1]
    h_pad = _round_up(hidden, 128)

    w1p = jnp.zeros((in_dim, h_pad), compute_dtype).at[:, :hidden].set(w1.astype(compute_dtype))
    b1p = jnp.zeros((1, h_pad), jnp.float32).at[:, :hidden].set(
        b1.reshape(1, hidden).astype(jnp.float32))
    w2p = jnp.zeros((h_pad, out_dim), compute_dtype).at[:hidden, :].set(w2.astype(compute_dtype))
    b2p = b2.reshape(1, out_dim).astype(jnp.float32)
    return w1p, b1p, w2p, b2p


def actor_forward(x, w1p, b1p, w2p, b2p, *, block_rows=1024):
    """Fused forward pass of the Actor MLP on prepared params.

    x: (B, in_dim) float32 (cast to the weights' compute dtype on the fly)
    returns logits (B, out_dim) float32
    """
    B, in_dim = x.shape
    h_pad = w1p.shape[1]
    out_dim = w2p.shape[1]
    compute_dtype = w1p.dtype

    xp = x.astype(compute_dtype)

    # Batch tile: big enough to amortize ~0.35us/step overhead, capped at ceil(B/2) (sublane-rounded)
    # so the grid has >= 2 steps whenever possible -> both v7x TensorCores participate.
    tb = min(block_rows, _round_up(pl.cdiv(B, 2), 8))
    grid = (pl.cdiv(B, tb),)   # ragged last block: OOB input rows are junk, OOB output rows masked

    itemsize = jnp.dtype(compute_dtype).itemsize
    flops = 2 * B * (in_dim * h_pad + h_pad * out_dim)
    bytes_accessed = (B * in_dim * itemsize            # x read
                      + B * out_dim * 4                # logits write (f32, unpadded)
                      + w1p.size * itemsize + b1p.size * 4
                      + w2p.size * itemsize + b2p.size * 4)

    return pl.pallas_call(
        actor_kernel,
        out_shape=jax.ShapeDtypeStruct((B, out_dim), jnp.float32),
        grid=grid,
        in_specs=[
            pl.BlockSpec((tb, in_dim), lambda i: (i, 0)),       # batch-tiled activations (pipelined)
            pl.BlockSpec((in_dim, h_pad), lambda i: (0, 0)),    # weights/biases resident across grid
            pl.BlockSpec((1, h_pad), lambda i: (0, 0)),
            pl.BlockSpec((h_pad, out_dim), lambda i: (0, 0)),
            pl.BlockSpec((1, out_dim), lambda i: (0, 0)),
        ],
        out_specs=pl.BlockSpec((tb, out_dim), lambda i: (i, 0)),  # unpadded, narrow writeback
        compiler_params=pltpu.CompilerParams(
            dimension_semantics=("parallel",),   # independent batch tiles -> split across TCs (v7x)
        ),
        cost_estimate=pl.CostEstimate(
            flops=flops, transcendentals=0, bytes_accessed=bytes_accessed),
    )(xp, w1p, b1p, w2p, b2p)


def init_actor_params(key, input_dim, output_dim, hidden=10):
    """Deterministic init mirroring nn.Linear's U(-1/sqrt(fan_in), 1/sqrt(fan_in))."""
    k1, k2, k3, k4 = jax.random.split(key, 4)
    bound1 = 1.0 / jnp.sqrt(float(input_dim))
    bound2 = 1.0 / jnp.sqrt(float(hidden))
    # stored as (in, out) for the kernel (PyTorch stores (out, in))
    w1 = jax.random.uniform(k1, (input_dim, hidden), jnp.float32, -bound1, bound1)
    b1 = jax.random.uniform(k2, (1, hidden), jnp.float32, -bound1, bound1)
    w2 = jax.random.uniform(k3, (hidden, output_dim), jnp.float32, -bound2, bound2)
    b2 = jax.random.uniform(k4, (1, output_dim), jnp.float32, -bound2, bound2)
    return w1, b1, w2, b2


if __name__ == "__main__":
    key = jax.random.PRNGKey(0)
    batch, input_dim, output_dim = 2, 16, 4

    kx, kp = jax.random.split(key)
    x = jax.random.normal(kx, (batch, input_dim), dtype=jnp.float32)
    w1, b1, w2, b2 = init_actor_params(kp, input_dim, output_dim)
    ref = jnp.maximum(x @ w1 + b1, 0.0) @ w2 + b2

    # exact f32 path (params prepared once, outside the forward)
    params_f32 = prepare_actor_params(w1, b1, w2, b2, compute_dtype=jnp.float32)
    out = jax.block_until_ready(actor_forward(x, *params_f32))
    assert out.shape == (batch, output_dim)
    assert jnp.allclose(out, ref, atol=1e-5, rtol=1e-5)

    # bf16 compute path (x, W and the inter-layer activation h are rounded to bf16; accumulation,
    # bias add and ReLU stay in f32) — looser tolerance from that rounding.
    params_bf16 = prepare_actor_params(w1, b1, w2, b2, compute_dtype=jnp.bfloat16)
    out_bf16 = jax.block_until_ready(actor_forward(x, *params_bf16))
    assert jnp.allclose(out_bf16, ref, atol=5e-2, rtol=5e-2)

    # fleet-style batched path: exercises the batch grid (tb=1024, grid=(2,)) with resident weights
    # and a non-divisible batch to hit the ragged last block (grid=(3,) for B=2050).
    big_x = jax.random.normal(jax.random.PRNGKey(1), (2050, input_dim), dtype=jnp.float32)
    out_big = jax.block_until_ready(actor_forward(big_x, *params_f32))
    ref_big = jnp.maximum(big_x @ w1 + b1, 0.0) @ w2 + b2
    assert out_big.shape == (2050, output_dim)
    assert jnp.allclose(out_big, ref_big, atol=1e-4, rtol=1e-4)

    print("KERNEL_OK")
</pallas_src>

<mosaic_0001>
module attributes {stable_mosaic.version = 11 : i64} {
  func.func @actor_kernel(%arg0: i32, %arg1: memref<8x16xf32, #tpu.memory_space<vmem>>, %arg2: memref<16x128xf32, #tpu.memory_space<vmem>>, %arg3: memref<1x128xf32, #tpu.memory_space<vmem>>, %arg4: memref<128x4xf32, #tpu.memory_space<vmem>>, %arg5: memref<1x4xf32, #tpu.memory_space<vmem>>, %arg6: memref<8x4xf32, #tpu.memory_space<vmem>>) attributes {dimension_semantics = [#tpu.dimension_semantics<parallel>], iteration_bounds = array<i64: 1>, scalar_prefetch = 0 : i64, scratch_operands = 0 : i64, tpu.core_type = #tpu.core_type<tc>, window_params = [{transform_indices = @transform_0, window_bounds = array<i64: 8, 16>}, {pipeline_mode = #tpu.pipeline_mode<synchronous>, transform_indices = @transform_1, window_bounds = array<i64: 16, 128>}, {pipeline_mode = #tpu.pipeline_mode<synchronous>, transform_indices = @transform_2, window_bounds = array<i64: 1, 128>}, {pipeline_mode = #tpu.pipeline_mode<synchronous>, transform_indices = @transform_3, window_bounds = array<i64: 128, 4>}, {pipeline_mode = #tpu.pipeline_mode<synchronous>, transform_indices = @transform_4, window_bounds = array<i64: 1, 4>}, {transform_indices = @transform_5, window_bounds = array<i64: 8, 4>}]} {
    %c0 = arith.constant 0 : index
    %c0_0 = arith.constant 0 : index
    %0 = vector.load %arg1[%c0, %c0_0] : memref<8x16xf32, #tpu.memory_space<vmem>>, vector<8x16xf32>
    %c0_1 = arith.constant 0 : index
    %c0_2 = arith.constant 0 : index
    %1 = vector.load %arg2[%c0_1, %c0_2] : memref<16x128xf32, #tpu.memory_space<vmem>>, vector<16x128xf32>
    %cst = arith.constant dense<0.000000e+00> : vector<8x128xf32>
    %2 = tpu.matmul %0, %1, %cst {dimension_numbers = #tpu.dot_dimension_numbers<[1], [0], [0], [1], [0, 0, 1, 1], [], []>} : vector<8x16xf32>, vector<16x128xf32>, vector<8x128xf32> -> vector<8x128xf32>
    %c0_3 = arith.constant 0 : index
    %c0_4 = arith.constant 0 : index
    %3 = vector.load %arg3[%c0_3, %c0_4] : memref<1x128xf32, #tpu.memory_space<vmem>>, vector<1x128xf32>
    %4 = vector.broadcast %3 : vector<1x128xf32> to vector<8x128xf32>
    %5 = arith.addf %2, %4 : vector<8x128xf32>
    %cst_5 = arith.constant 0.000000e+00 : f32
    %6 = vector.broadcast %cst_5 : f32 to vector<8x128xf32>
    %7 = arith.maximumf %5, %6 : vector<8x128xf32>
    %c0_6 = arith.constant 0 : index
    %c0_7 = arith.constant 0 : index
    %8 = vector.load %arg4[%c0_6, %c0_7] : memref<128x4xf32, #tpu.memory_space<vmem>>, vector<128x4xf32>
    %cst_8 = arith.constant dense<0.000000e+00> : vector<8x4xf32>
    %9 = tpu.matmul %7, %8, %cst_8 {dimension_numbers = #tpu.dot_dimension_numbers<[1], [0], [0], [1], [0, 0, 1, 1], [], []>} : vector<8x128xf32>, vector<128x4xf32>, vector<8x4xf32> -> vector<8x4xf32>
    %c0_9 = arith.constant 0 : index
    %c0_10 = arith.constant 0 : index
    %10 = vector.load %arg5[%c0_9, %c0_10] : memref<1x4xf32, #tpu.memory_space<vmem>>, vector<1x4xf32>
    %11 = vector.broadcast %10 : vector<1x4xf32> to vector<8x4xf32>
    %12 = arith.addf %9, %11 : vector<8x4xf32>
    %c0_11 = arith.constant 0 : index
    %c0_12 = arith.constant 0 : index
    %13 = vector.load %arg6[%c0_11, %c0_12] : memref<8x4xf32, #tpu.memory_space<vmem>>, vector<8x4xf32>
    tpu.vector_store %arg6[%c0_11, %c0_12], %12 {strides = array<i32>} : memref<8x4xf32, #tpu.memory_space<vmem>>, vector<8x4xf32>,
    return
  }
  func.func @transform_0(%arg0: i32) -> (i32, i32) {
    %c0_i32 = arith.constant 0 : i32
    %c0_i32_0 = arith.constant 0 : i32
    return %arg0, %c0_i32 : i32, i32
  }
  func.func @transform_1(%arg0: i32) -> (i32, i32) {
    %c0_i32 = arith.constant 0 : i32
    %c0_i32_0 = arith.constant 0 : i32
    %c0_i32_1 = arith.constant 0 : i32
    return %c0_i32, %c0_i32_0 : i32, i32
  }
  func.func @transform_2(%arg0: i32) -> (i32, i32) {
    %c0_i32 = arith.constant 0 : i32
    %c0_i32_0 = arith.constant 0 : i32
    %c0_i32_1 = arith.constant 0 : i32
    return %c0_i32, %c0_i32_0 : i32, i32
  }
  func.func @transform_3(%arg0: i32) -> (i32, i32) {
    %c0_i32 = arith.constant 0 : i32
    %c0_i32_0 = arith.constant 0 : i32
    %c0_i32_1 = arith.constant 0 : i32
    return %c0_i32, %c0_i32_0 : i32, i32
  }
  func.func @transform_4(%arg0: i32) -> (i32, i32) {
    %c0_i32 = arith.constant 0 : i32
    %c0_i32_0 = arith.constant 0 : i32
    %c0_i32_1 = arith.constant 0 : i32
    return %c0_i32, %c0_i32_0 : i32, i32
  }
  func.func @transform_5(%arg0: i32) -> (i32, i32) {
    %c0_i32 = arith.constant 0 : i32
    %c0_i32_0 = arith.constant 0 : i32
    return %arg0, %c0_i32 : i32, i32
  }
}

</mosaic_0001>

<bundles_post_ra>
// kernel: tpu_custom_call.1
= control target key start
LH: loop header
LB: loop body
LE: loop exit
PB: predicated region body
PF: predicated region fallthrough
CT: control target
= control target key end

     0   :  { %10 = vsyncpa [#allocation3], 0  ;;  %v339_v2 = vmov 0.0|0.0   ;;  %vm340_vm0 = vmmov 0   ;;  %v341_v6 = vmov 0.0   ;;  %vm31_vm1 = vcmask 130048   ;;  %s450_s0 = inlined_call_operand.vmem [shape: f32[2,16], index: 0, kind: input, shape index: {}]   ;;  %s451_s1 = inlined_call_operand.vmem [shape: f32[16,128], index: 1, kind: input, shape index: {}]   ;;  %s452_s2 = inlined_call_operand.vmem [shape: f32[1,128], index: 2, kind: input, shape index: {}]   ;;  %s453_s3 = inlined_call_operand.vmem [shape: f32[128,4], index: 3, kind: input, shape index: {}]   ;;  %s454_s4 = inlined_call_operand.vmem [shape: f32[1,4], index: 4, kind: input, shape index: {}]   ;;  %s455_s5 = inlined_call_operand.hbm [shape: f32[2,4], index: 5, kind: output, shape index: {}]  }
   0x1   :  { %v22_v0 = vld [vmem:[%s451_s1] sm:$0xff]  ;;  %v23_v1 = vld [vmem:[%s451_s1 + $0x8] sm:$0xff]  ;;  %282 = vmatprep.subr.bf16.mxu0 %v339_v2  ;;  %285 = vmatprep.subr.bf16.mxu1 %v339_v2  ;;  %v108_v8 = vld [vmem:[%s453_s3 + $0x10] sm:$0xff]  ;;  %vm199_vm2 = vcmask 31744  }
   0x2   :  { %v283_v3 = vpack.c.bf16 %v23_v1, %v22_v0  ;;  %v106_v4 = vld [vmem:[%s453_s3] sm:$0xff]  ;;  %v107_v5 = vld [vmem:[%s453_s3 + $0x8] sm:$0xff]  ;;  %244 = vmatprep.mubr.msk.f32.mxu0 %vm340_vm0, %v341_v6  ;;  %v109_v9 = vld [vmem:[%s453_s3 + $0x18] sm:$0xff]  ;;  %279 = vmatprep.mubr.msk.f32.mxu1 %vm340_vm0, %v341_v6 }
   0x3   :  { %v286_v7 = vpack.c.bf16 %v107_v5, %v106_v4  ;;  %v21_v10 = vld [vmem:[%s450_s0] sm:$0xff]  ;;  %v289_v11 = vpack.c.bf16 %v109_v9, %v108_v8  ;;  %v111_v13 = vld [vmem:[%s453_s3 + $0x28] sm:$0xff]  ;;  %v112_v15 = vld [vmem:[%s453_s3 + $0x30] sm:$0xff] }
   0x4   :  { %284 = vmatpush3.bf16.msra.mxu0 %v283_v3  ;;  %v110_v12 = vld [vmem:[%s453_s3 + $0x20] sm:$0xff]  ;;  %v113_v16 = vld [vmem:[%s453_s3 + $0x38] sm:$0xff]  ;;  %v115_v19 = vld [vmem:[%s453_s3 + $0x48] sm:$0xff] }
   0x5   :  { %287 = vmatpush3.bf16.msra.mxu1 %v286_v7  ;;  %v292_v14 = vpack.c.bf16 %v111_v13, %v110_v12  ;;  %v295_v17 = vpack.c.bf16 %v113_v16, %v112_v15  ;;  %v114_v18 = vld [vmem:[%s453_s3 + $0x40] sm:$0xff]  ;;  %v116_v21 = vld [vmem:[%s453_s3 + $0x50] sm:$0xff]  ;;  %v117_v22 = vld [vmem:[%s453_s3 + $0x58] sm:$0xff] }
   0x6   :  { %288 = vmatprep.subr.bf16.mxu1 %v339_v2  ;;  %v298_v20 = vpack.c.bf16 %v115_v19, %v114_v18  ;;  %v301_v23 = vpack.c.bf16 %v117_v22, %v116_v21  ;;  %v118_v24 = vld [vmem:[%s453_s3 + $0x60] sm:$0xff]  ;;  %v119_v25 = vld [vmem:[%s453_s3 + $0x68] sm:$0xff]  ;;  %v120_v27 = vld [vmem:[%s453_s3 + $0x70] sm:$0xff] }
   0x7   :  { %245 = vmatmul.mubr.msk.f32.vlgmr.msra.gmra.mrb[0].mxu0 %vm31_vm1, %v21_v10  ;;  %v304_v26 = vpack.c.bf16 %v119_v25, %v118_v24  ;;  %v121_v28 = vld [vmem:[%s453_s3 + $0x78] sm:$0xff]  ;;  %v217_v30 = vld [vmem:[%s452_s2] ss:$0 sm:$0xff] }
   0x8   :  { %v307_v29 = vpack.c.bf16 %v121_v28, %v120_v27  ;;  %v219_v35 = vld [vmem:[%s454_s4] ss:$0 sm:$0xff] }
   0x9   :  { %290 = vmatpush3.bf16.msra.mxu1 %v289_v11 }
   0xa   :  { %291 = vmatprep.subr.bf16.mxu1 %v339_v2 }
   0xd   :  { %293 = vmatpush3.bf16.msra.mxu1 %v292_v14 }
   0xe   :  { %294 = vmatprep.subr.bf16.mxu1 %v339_v2 }
  0x11   :  { %296 = vmatpush3.bf16.msra.mxu1 %v295_v17 }
  0x12   :  { %297 = vmatprep.subr.bf16.mxu1 %v339_v2 }
  0x15   :  { %299 = vmatpush3.bf16.msra.mxu1 %v298_v20 }
  0x16   :  { %300 = vmatprep.subr.bf16.mxu1 %v339_v2 }
  0x19   :  { %302 = vmatpush3.bf16.msra.mxu1 %v301_v23 }
  0x1a   :  { %303 = vmatprep.subr.bf16.mxu1 %v339_v2 }
  0x1d   :  { %305 = vmatpush3.bf16.msra.mxu1 %v304_v26 }
  0x1e   :  { %306 = vmatprep.subr.bf16.mxu1 %v339_v2 }
  0x21   :  { %308 = vmatpush3.bf16.msra.mxu1 %v307_v29 }
  0xda   :  { %v101_v31 = vpop.f32.mrb[0].mxu0 }
  0xdb   :  { %v102_v32 = vadd.f32 %v217_v30, %v101_v31  ;;  %v246_v33 = vpop.f32.mrb[1].mxu0 }
  0xdd   :  { %v105_v34 = vmax.f32 %v102_v32, 0.0 }
  0xdf   :  { %280 = vmatmul.mubr.f32.vlgmr.msra.gmra.mrb[0].mxu1 %v105_v34 }
 0x1b2   :  { %v195_v36 = vpop.f32.mrb[0].mxu1 }
 0x1b3   :  { %v196_v37 = vadd.f32 %v219_v35, %v195_v36  ;;  %v281_v38 = vpop.f32.mrb[1].mxu1 }
 0x1b5   :  { %200 = vst.msk [vmem:[#allocation2] sm:$0xff] %vm199_vm2, %v196_v37 }
 0x1b6   :  { %205 = vsyncadd [#allocation3], 96  ;;  %s342_s3 = smov [#allocation2]  }
 0x1b7   :  { %s206_s7 = sshll.u32 %s342_s3, 4  ;;  %s207_s7 = int_to_ptr.vmem [resolvable:$true] %s206_s7 }
 0x1b8   :  { %s315_s8 = scalar_lea.vmem %s207_s7, 32  ;;  %s319_s2 = scalar_lea.vmem %s207_s7, 128 }
 0x1b9   :  { %p316_p0 = scmp.ne.s32.totalorder %s207_s7, %s315_s8  ;;  %p320_p1 = scmp.lt.s32.totalorder %s207_s7, %s207_s7 }
 0x1ba   :  { %p321_p2 = scmp.lt.s32.totalorder %s319_s2, %s315_s8 }
 0x1bc   :  { %p322_p3 = por %p321_p2, %p320_p1 }
 0x1be   :  { %p323_p4 = pnand %p322_p3, %p316_p0 }
 0x1c0   :  { %326 = shalt.err (!%p323_p4)
}
 0x1c1   :  { %s327_s4 = scalar_lea.hbm %s455_s5, 32 }
 0x1c2   :  { %p328_p5 = scmp.ne.s32.totalorder %s455_s5, %s327_s4  ;;  %p331_p6 = scmp.lt.u32.totalorder %s327_s4, %s455_s5 }
 0x1c4   :  { %p333_p7 = pnand %p331_p6, %p328_p5 }
 0x1c6   :  { %336 = shalt.err (!%p333_p7)
}
 0x1c7   :  { %s343_s14 = smov 32   ;;  %s344_s15 = smov 2  }
 0x1c8   :  { %212 = dma.vmem_to_hbm [thread:$0]  %s207_s7, 32, %s455_s5, [#allocation3], %s343_s14, %s343_s14, %s344_s15  }
 0x1c9   :  { %337 = dma.done.wait [#allocation3], 128  }
 0x1ca   :  { %338 = vsyncadd [#allocation3], 4294967168 }
 0x1cb   :  { %216 = vsyncpa [#allocation3], 1 }

</bundles_post_ra>
